<compile_context>
chip_gen: v5e
topology: v5e:2x2
jax: 0.10.0
libtpu: 0.0.40
codegen_flags: <defaults>
</compile_context>

<pallas_src>
import math
import jax
import jax.numpy as jnp
from jax.experimental import pallas as pl
from jax.experimental.pallas import tpu as pltpu


def _round_up(x, m):
    return ((x + m - 1) // m) * m


def mlp_kernel(x_ref, w1_ref, b1_ref, w2_ref, b2_ref, o_ref, acc_ref):
    """One (row-tile, H-slab) step: fc1 partial -> GELU -> fc2 partial accumulated in f32."""
    j = pl.program_id(1)

    @pl.when(j == 0)
    def _():
        # Initialize the accumulator with the fc2 bias (broadcast over the row tile).
        acc_ref[...] = jnp.broadcast_to(
            b2_ref[...].astype(jnp.float32), acc_ref.shape)

    # fc1 partial over this hidden slab.  MXU inputs stay in the native dtype
    # (bf16 stays bf16); f32 accumulation via preferred_element_type.
    h = jnp.dot(x_ref[...], w1_ref[...], preferred_element_type=jnp.float32)
    h = h + b1_ref[...].astype(jnp.float32)

    # Exact erf-based GELU (matches torch.nn.GELU default), math in f32.
    inv_sqrt2 = jnp.float32(1.0 / math.sqrt(2.0))
    h = 0.5 * h * (1.0 + jax.lax.erf(h * inv_sqrt2))

    # dropout(p=0.0) is identity — nothing to do.

    # fc2 partial product for this H slab, accumulated into f32 scratch.
    acc_ref[...] += jnp.dot(h.astype(w2_ref.dtype), w2_ref[...],
                            preferred_element_type=jnp.float32)

    @pl.when(j == pl.num_programs(1) - 1)
    def _():
        o_ref[...] = acc_ref[...].astype(o_ref.dtype)


def mlp_pallas(x, w1, b1, w2, b2, *, tile_rows=256, tile_h=512):
    """x: (B, N, C_in); w1: (C_in, H); b1: (H,); w2: (H, C_out); b2: (C_out,).

    Weights are stored (in, out), i.e. already transposed vs. nn.Linear.weight,
    so the kernel does plain row-major matmuls (x @ W + b).
    """
    B, N, C_in = x.shape
    H = w1.shape[1]
    C_out = w2.shape[1]
    dtype = x.dtype

    rows = B * N

    # Adaptive tiles: never larger than the (padded) problem size.
    tile_rows = min(tile_rows, _round_up(rows, 8))
    tile_h = min(tile_h, _round_up(H, 128))

    rows_p = _round_up(rows, tile_rows)
    cin_p = _round_up(C_in, 128)
    h_p = _round_up(H, tile_h)
    cout_p = _round_up(C_out, 128)

    # Zero-pad so every tile is lane-dense (last dim % 128 == 0).  Padded input
    # channels / hidden units contribute exactly zero because the corresponding
    # weight rows are zero; padded rows are sliced off at the end.  Skip the
    # padding copy entirely when shapes are already aligned.
    x2d = x.reshape(rows, C_in)
    if (rows_p, cin_p) != (rows, C_in):
        x2d = jnp.zeros((rows_p, cin_p), dtype).at[:rows, :C_in].set(x2d)
    if (cin_p, h_p) != (C_in, H):
        w1_p = jnp.zeros((cin_p, h_p), w1.dtype).at[:C_in, :H].set(w1)
    else:
        w1_p = w1
    if h_p != H:
        b1_p = jnp.zeros((1, h_p), b1.dtype).at[0, :H].set(b1)
    else:
        b1_p = b1.reshape(1, H)
    if (h_p, cout_p) != (H, C_out):
        w2_p = jnp.zeros((h_p, cout_p), w2.dtype).at[:H, :C_out].set(w2)
    else:
        w2_p = w2
    if cout_p != C_out:
        b2_p = jnp.zeros((1, cout_p), b2.dtype).at[0, :C_out].set(b2)
    else:
        b2_p = b2.reshape(1, C_out)

    grid = (rows_p // tile_rows, h_p // tile_h)

    itemsize = jnp.dtype(dtype).itemsize
    flops = 2 * rows_p * (cin_p * h_p + h_p * cout_p)
    bytes_accessed = (x2d.size + w1_p.size + b1_p.size + w2_p.size + b2_p.size
                      + rows_p * cout_p) * itemsize

    out2d = pl.pallas_call(
        mlp_kernel,
        out_shape=jax.ShapeDtypeStruct((rows_p, cout_p), dtype),
        grid_spec=pltpu.PrefetchScalarGridSpec(
            num_scalar_prefetch=0,
            grid=grid,
            in_specs=[
                pl.BlockSpec((tile_rows, cin_p), lambda i, j: (i, 0)),  # x row tile
                pl.BlockSpec((cin_p, tile_h), lambda i, j: (0, j)),     # w1 H-slab
                pl.BlockSpec((1, tile_h), lambda i, j: (0, j)),         # b1 H-slab
                pl.BlockSpec((tile_h, cout_p), lambda i, j: (j, 0)),    # w2 H-slab
                pl.BlockSpec((1, cout_p), lambda i, j: (0, 0)),         # b2
            ],
            out_specs=pl.BlockSpec((tile_rows, cout_p), lambda i, j: (i, 0)),
            scratch_shapes=[pltpu.VMEM((tile_rows, cout_p), jnp.float32)],
        ),
        compiler_params=pltpu.CompilerParams(
            dimension_semantics=("parallel", "arbitrary"),
            vmem_limit_bytes=48 * 1024 * 1024,
        ),
        cost_estimate=pl.CostEstimate(
            flops=flops,
            transcendentals=rows_p * h_p,
            bytes_accessed=bytes_accessed,
        ),
    )(x2d, w1_p, b1_p, w2_p, b2_p)

    return out2d[:rows, :C_out].reshape(B, N, C_out)


def mlp_reference(x, w1, b1, w2, b2):
    h = jnp.dot(x, w1) + b1
    h = 0.5 * h * (1.0 + jax.lax.erf(h / jnp.sqrt(2.0)))
    return jnp.dot(h, w2) + b2


if __name__ == "__main__":
    # Small shapes consistent with Swin's Mlp usage: (B, N, C) tokens.
    B, N = 2, 8
    in_features = 32
    hidden_features = 64
    out_features = 32

    key = jax.random.PRNGKey(0)
    kx, kw1, kb1, kw2, kb2 = jax.random.split(key, 5)

    x = jax.random.normal(kx, (B, N, in_features), dtype=jnp.float32)

    # Deterministic synthetic parameters (nn.Linear init ranges, stored transposed as (in, out)).
    bound1 = 1.0 / math.sqrt(in_features)
    w1 = jax.random.uniform(kw1, (in_features, hidden_features), jnp.float32, -bound1, bound1)
    b1 = jax.random.uniform(kb1, (hidden_features,), jnp.float32, -bound1, bound1)
    bound2 = 1.0 / math.sqrt(hidden_features)
    w2 = jax.random.uniform(kw2, (hidden_features, out_features), jnp.float32, -bound2, bound2)
    b2 = jax.random.uniform(kb2, (out_features,), jnp.float32, -bound2, bound2)

    out = mlp_pallas(x, w1, b1, w2, b2)
    out = jax.block_until_ready(out)

    # Correctness check against pure-JAX reference.
    ref = mlp_reference(x, w1, b1, w2, b2)
    assert out.shape == ref.shape, "shape mismatch vs reference"
    assert jnp.allclose(out, ref, atol=1e-4, rtol=1e-4), "mismatch vs reference"

    print("KERNEL_OK")
</pallas_src>

<mosaic_0001>
module attributes {stable_mosaic.version = 11 : i64} {
  func.func @mlp_kernel(%arg0: i32, %arg1: i32, %arg2: memref<16x128xf32, #tpu.memory_space<vmem>>, %arg3: memref<128x128xf32, #tpu.memory_space<vmem>>, %arg4: memref<1x128xf32, #tpu.memory_space<vmem>>, %arg5: memref<128x128xf32, #tpu.memory_space<vmem>>, %arg6: memref<1x128xf32, #tpu.memory_space<vmem>>, %arg7: memref<16x128xf32, #tpu.memory_space<vmem>>, %arg8: memref<16x128xf32, #tpu.memory_space<vmem>>) attributes {dimension_semantics = [#tpu.dimension_semantics<parallel>, #tpu.dimension_semantics<arbitrary>], iteration_bounds = array<i64: 1, 1>, scalar_prefetch = 0 : i64, scratch_operands = 1 : i64, tpu.core_type = #tpu.core_type<tc>, window_params = [{transform_indices = @transform_0, window_bounds = array<i64: 16, 128>}, {transform_indices = @transform_1, window_bounds = array<i64: 128, 128>}, {transform_indices = @transform_2, window_bounds = array<i64: 1, 128>}, {transform_indices = @transform_3, window_bounds = array<i64: 128, 128>}, {pipeline_mode = #tpu.pipeline_mode<synchronous>, transform_indices = @transform_4, window_bounds = array<i64: 1, 128>}, {transform_indices = @transform_5, window_bounds = array<i64: 16, 128>}]} {
    %c0_i32 = arith.constant 0 : i32
    %0 = arith.cmpi eq, %arg1, %c0_i32 : i32
    %1 = arith.extui %0 : i1 to i32
    %c0_i32_0 = arith.constant 0 : i32
    %2 = arith.cmpi ne, %1, %c0_i32_0 : i32
    scf.if %2 {
      %c0_18 = arith.constant 0 : index
      %c0_19 = arith.constant 0 : index
      %25 = vector.load %arg6[%c0_18, %c0_19] : memref<1x128xf32, #tpu.memory_space<vmem>>, vector<1x128xf32>
      %26 = vector.shape_cast %25 : vector<1x128xf32> to vector<1x128xf32>
      %27 = vector.broadcast %26 : vector<1x128xf32> to vector<16x128xf32>
      %c0_20 = arith.constant 0 : index
      %c0_21 = arith.constant 0 : index
      %28 = vector.load %arg8[%c0_20, %c0_21] : memref<16x128xf32, #tpu.memory_space<vmem>>, vector<16x128xf32>
      tpu.vector_store %arg8[%c0_20, %c0_21], %27 {strides = array<i32>} : memref<16x128xf32, #tpu.memory_space<vmem>>, vector<16x128xf32>,
    } else {
    }
    %c0 = arith.constant 0 : index
    %c0_1 = arith.constant 0 : index
    %3 = vector.load %arg2[%c0, %c0_1] : memref<16x128xf32, #tpu.memory_space<vmem>>, vector<16x128xf32>
    %c0_2 = arith.constant 0 : index
    %c0_3 = arith.constant 0 : index
    %4 = vector.load %arg3[%c0_2, %c0_3] : memref<128x128xf32, #tpu.memory_space<vmem>>, vector<128x128xf32>
    %cst = arith.constant dense<0.000000e+00> : vector<16x128xf32>
    %5 = tpu.matmul %3, %4, %cst {dimension_numbers = #tpu.dot_dimension_numbers<[1], [0], [0], [1], [0, 0, 1, 1], [], []>} : vector<16x128xf32>, vector<128x128xf32>, vector<16x128xf32> -> vector<16x128xf32>
    %c0_4 = arith.constant 0 : index
    %c0_5 = arith.constant 0 : index
    %6 = vector.load %arg4[%c0_4, %c0_5] : memref<1x128xf32, #tpu.memory_space<vmem>>, vector<1x128xf32>
    %7 = vector.broadcast %6 : vector<1x128xf32> to vector<16x128xf32>
    %8 = arith.addf %5, %7 : vector<16x128xf32>
    %cst_6 = arith.constant 5.000000e-01 : f32
    %9 = vector.broadcast %cst_6 : f32 to vector<16x128xf32>
    %10 = arith.mulf %9, %8 : vector<16x128xf32>
    %cst_7 = arith.constant 0.707106769 : f32
    %11 = vector.broadcast %cst_7 : f32 to vector<16x128xf32>
    %12 = arith.mulf %8, %11 : vector<16x128xf32>
    %13 = math.erf %12 : vector<16x128xf32>
    %cst_8 = arith.constant 1.000000e+00 : f32
    %14 = vector.broadcast %cst_8 : f32 to vector<16x128xf32>
    %15 = arith.addf %14, %13 : vector<16x128xf32>
    %16 = arith.mulf %10, %15 : vector<16x128xf32>
    %c0_9 = arith.constant 0 : index
    %c0_10 = arith.constant 0 : index
    %17 = vector.load %arg8[%c0_9, %c0_10] : memref<16x128xf32, #tpu.memory_space<vmem>>, vector<16x128xf32>
    %c0_11 = arith.constant 0 : index
    %c0_12 = arith.constant 0 : index
    %18 = vector.load %arg5[%c0_11, %c0_12] : memref<128x128xf32, #tpu.memory_space<vmem>>, vector<128x128xf32>
    %cst_13 = arith.constant dense<0.000000e+00> : vector<16x128xf32>
    %19 = tpu.matmul %16, %18, %cst_13 {dimension_numbers = #tpu.dot_dimension_numbers<[1], [0], [0], [1], [0, 0, 1, 1], [], []>} : vector<16x128xf32>, vector<128x128xf32>, vector<16x128xf32> -> vector<16x128xf32>
    %20 = arith.addf %17, %19 : vector<16x128xf32>
    %c0_14 = arith.constant 0 : index
    %c0_15 = arith.constant 0 : index
    %21 = vector.load %arg8[%c0_14, %c0_15] : memref<16x128xf32, #tpu.memory_space<vmem>>, vector<16x128xf32>
    tpu.vector_store %arg8[%c0_14, %c0_15], %20 {strides = array<i32>} : memref<16x128xf32, #tpu.memory_space<vmem>>, vector<16x128xf32>,
    %c0_i32_16 = arith.constant 0 : i32
    %22 = arith.cmpi eq, %arg1, %c0_i32_16 : i32
    %23 = arith.extui %22 : i1 to i32
    %c0_i32_17 = arith.constant 0 : i32
    %24 = arith.cmpi ne, %23, %c0_i32_17 : i32
    scf.if %24 {
      %c0_18 = arith.constant 0 : index
      %c0_19 = arith.constant 0 : index
      %25 = vector.load %arg8[%c0_18, %c0_19] : memref<16x128xf32, #tpu.memory_space<vmem>>, vector<16x128xf32>
      %c0_20 = arith.constant 0 : index
      %c0_21 = arith.constant 0 : index
      %26 = vector.load %arg7[%c0_20, %c0_21] : memref<16x128xf32, #tpu.memory_space<vmem>>, vector<16x128xf32>
      tpu.vector_store %arg7[%c0_20, %c0_21], %25 {strides = array<i32>} : memref<16x128xf32, #tpu.memory_space<vmem>>, vector<16x128xf32>,
    } else {
    }
    return
  }
  func.func @transform_0(%arg0: i32, %arg1: i32) -> (i32, i32) {
    %c0_i32 = arith.constant 0 : i32
    %c0_i32_0 = arith.constant 0 : i32
    return %arg0, %c0_i32 : i32, i32
  }
  func.func @transform_1(%arg0: i32, %arg1: i32) -> (i32, i32) {
    %c0_i32 = arith.constant 0 : i32
    %c0_i32_0 = arith.constant 0 : i32
    return %c0_i32, %arg1 : i32, i32
  }
  func.func @transform_2(%arg0: i32, %arg1: i32) -> (i32, i32) {
    %c0_i32 = arith.constant 0 : i32
    %c0_i32_0 = arith.constant 0 : i32
    return %c0_i32, %arg1 : i32, i32
  }
  func.func @transform_3(%arg0: i32, %arg1: i32) -> (i32, i32) {
    %c0_i32 = arith.constant 0 : i32
    %c0_i32_0 = arith.constant 0 : i32
    return %arg1, %c0_i32 : i32, i32
  }
  func.func @transform_4(%arg0: i32, %arg1: i32) -> (i32, i32) {
    %c0_i32 = arith.constant 0 : i32
    %c0_i32_0 = arith.constant 0 : i32
    %c0_i32_1 = arith.constant 0 : i32
    return %c0_i32, %c0_i32_0 : i32, i32
  }
  func.func @transform_5(%arg0: i32, %arg1: i32) -> (i32, i32) {
    %c0_i32 = arith.constant 0 : i32
    %c0_i32_0 = arith.constant 0 : i32
    return %arg0, %c0_i32 : i32, i32
  }
}

</mosaic_0001>

<bundles_post_ra>
// kernel: tpu_custom_call.1
= control target key start
LH: loop header
LB: loop body
LE: loop exit
PB: predicated region body
PF: predicated region fallthrough
CT: control target
= control target key end

     0   :  { %10 = vsyncpa [#allocation4], 0  ;;  %s527_s0 = inlined_call_operand.hbm [shape: f32[16,128], index: 0, kind: input, shape index: {}]   ;;  %s528_s1 = inlined_call_operand.hbm [shape: f32[128,128], index: 1, kind: input, shape index: {}]   ;;  %s529_s2 = inlined_call_operand.vmem [shape: f32[1,128], index: 2, kind: input, shape index: {}]   ;;  %s530_s3 = inlined_call_operand.hbm [shape: f32[128,128], index: 3, kind: input, shape index: {}]   ;;  %s531_s4 = inlined_call_operand.vmem [shape: f32[1,128], index: 4, kind: input, shape index: {}]   ;;  %s532_s5 = inlined_call_operand.hbm [shape: f32[16,128], index: 5, kind: output, shape index: {}]  }
   0x1   :  { %11 = vsyncpa [#allocation7], 0 }
   0x2   :  { %12 = vsyncpa [#allocation5], 0  ;;  %s30_s20 = sshll.u32 %s528_s1, 4  ;;  %s431_s21 = smov [#allocation6]   ;;  %s31_s20 = int_to_ptr.hbm [resolvable:$true] %s30_s20 }
   0x3   :  { %s32_s22 = sshll.u32 %s431_s21, 4  ;;  %s17_s25 = sshll.u32 %s527_s0, 4  ;;  %s33_s22 = int_to_ptr.vmem [resolvable:$true] %s32_s22  ;;  %s18_s25 = int_to_ptr.hbm [resolvable:$true] %s17_s25 }
   0x4   :  { %s432_s26 = smov 128   ;;  %s433_s27 = smov 8  }
   0x5   :  { %38 = dma.hbm_to_vmem [thread:$0]  %s31_s20, 2048, %s33_s22, [#allocation7], %s432_s26, %s432_s26, %s433_s27  }
   0x6   :  { %s434_s28 = smov [#allocation3]   ;;  %s45_s1 = sshll.u32 %s530_s3, 4  ;;  %s46_s1 = int_to_ptr.hbm [resolvable:$true] %s45_s1 }
   0x7   :  { %s19_s29 = sshll.u32 %s434_s28, 4  ;;  %s435_s0 = smov [#allocation8]   ;;  %s20_s29 = int_to_ptr.vmem [resolvable:$true] %s19_s29 }
   0x8   :  { %25 = dma.hbm_to_vmem [thread:$0]  %s18_s25, 256, %s20_s29, [#allocation4], %s432_s26, %s432_s26, %s433_s27  }
   0x9   :  { %s47_s7 = sshll.u32 %s435_s0, 4  ;;  %s48_s7 = int_to_ptr.vmem [resolvable:$true] %s47_s7 }
   0xa   :  { %53 = dma.hbm_to_vmem [thread:$0]  %s46_s1, 2048, %s48_s7, [#allocation7], %s432_s26, %s432_s26, %s433_s27  }
   0xb   :  { %425 = dma.done.wait [#allocation4], 256  }
   0xc   :  { %426 = vsyncadd [#allocation4], 4294967040 }
   0xd   :  { %427 = dma.done.wait [#allocation7], 4096  }
   0xe   :  { %428 = vsyncadd [#allocation7], 4294963200  ;;  %v95_v0 = vld [vmem:[#allocation6 + $0x78] sm:$0xff]  ;;  %v94_v1 = vld [vmem:[#allocation6 + $0x70] sm:$0xff]  ;;  %s436_s10 = smov [#allocation9]   ;;  %s269_s14 = sshll.u32 %s532_s5, 4  ;;  %s270_s14 = int_to_ptr.hbm [resolvable:$true] %s269_s14 }
   0xf   :  { %100 = vmatpush.msra.mxu0 %v95_v0  ;;  %285 = vmatpush.msra.mxu2 %v95_v0  ;;  %v93_v2 = vld [vmem:[#allocation6 + $0x68] sm:$0xff]  ;;  %v92_v3 = vld [vmem:[#allocation6 + $0x60] sm:$0xff]  ;;  %v91_v4 = vld [vmem:[#allocation6 + $0x58] sm:$0xff]  ;;  %s267_s11 = sshll.u32 %s436_s10, 4  ;;  %s268_s11 = int_to_ptr.vmem [resolvable:$true] %s267_s11 }
  0x10   :  { %v90_v5 = vld [vmem:[#allocation6 + $0x50] sm:$0xff]  ;;  %v89_v6 = vld [vmem:[#allocation6 + $0x48] sm:$0xff]  ;;  %v88_v7 = vld [vmem:[#allocation6 + $0x40] sm:$0xff] }
  0x11   :  { %101 = vmatpush.msra.mxu0 %v94_v1  ;;  %286 = vmatpush.msra.mxu2 %v94_v1  ;;  %v87_v8 = vld [vmem:[#allocation6 + $0x38] sm:$0xff]  ;;  %v86_v9 = vld [vmem:[#allocation6 + $0x30] sm:$0xff]  ;;  %v85_v10 = vld [vmem:[#allocation6 + $0x28] sm:$0xff] }
  0x12   :  { %v84_v11 = vld [vmem:[#allocation6 + $0x20] sm:$0xff]  ;;  %v83_v12 = vld [vmem:[#allocation6 + $0x18] sm:$0xff]  ;;  %v82_v13 = vld [vmem:[#allocation6 + $0x10] sm:$0xff] }
  0x13   :  { %102 = vmatpush.msra.mxu0 %v93_v2  ;;  %287 = vmatpush.msra.mxu2 %v93_v2  ;;  %v81_v14 = vld [vmem:[#allocation6 + $0x8] sm:$0xff]  ;;  %v80_v15 = vld [vmem:[#allocation6] sm:$0xff]  ;;  %v78_v16 = vld [vmem:[#allocation3] sm:$0xff] }
  0x14   :  { %v79_v17 = vld [vmem:[#allocation3 + $0x8] sm:$0xff]  ;;  %v227_v19 = vld [vmem:[#allocation8 + $0x70] sm:$0xff]  ;;  %v226_v20 = vld [vmem:[#allocation8 + $0x68] sm:$0xff] }
  0x15   :  { %103 = vmatpush.msra.mxu0 %v92_v3  ;;  %288 = vmatpush.msra.mxu2 %v92_v3  ;;  %v228_v18 = vld [vmem:[#allocation8 + $0x78] sm:$0xff]  ;;  %v225_v21 = vld [vmem:[#allocation8 + $0x60] sm:$0xff]  ;;  %v323_v22 = vld [vmem:[%s529_s2] ss:$0 sm:$0xff] }
  0x16   :  { %229 = vmatpush.msra.mxu1 %v228_v18  ;;  %301 = vmatpush.msra.mxu3 %v228_v18  ;;  %v224_v23 = vld [vmem:[#allocation8 + $0x58] sm:$0xff]  ;;  %v223_v25 = vld [vmem:[#allocation8 + $0x50] sm:$0xff]  ;;  %v222_v27 = vld [vmem:[#allocation8 + $0x48] sm:$0xff] }
  0x17   :  { %104 = vmatpush.msra.mxu0 %v91_v4  ;;  %289 = vmatpush.msra.mxu2 %v91_v4  ;;  %v221_v29 = vld [vmem:[#allocation8 + $0x40] sm:$0xff]  ;;  %v220_v30 = vld [vmem:[#allocation8 + $0x38] sm:$0xff]  ;;  %v219_v33 = vld [vmem:[#allocation8 + $0x30] sm:$0xff] }
  0x18   :  { %230 = vmatpush.msra.mxu1 %v227_v19  ;;  %302 = vmatpush.msra.mxu3 %v227_v19  ;;  %v218_v36 = vld [vmem:[#allocation8 + $0x28] sm:$0xff]  ;;  %v217_v39 = vld [vmem:[#allocation8 + $0x20] sm:$0xff]  ;;  %v216_v43 = vld [vmem:[#allocation8 + $0x18] sm:$0xff] }
  0x19   :  { %105 = vmatpush.msra.mxu0 %v90_v5  ;;  %290 = vmatpush.msra.mxu2 %v90_v5  ;;  %v215_v47 = vld [vmem:[#allocation8 + $0x10] sm:$0xff]  ;;  %v214_v52 = vld [vmem:[#allocation8 + $0x8] sm:$0xff]  ;;  %v213_v56 = vld [vmem:[#allocation8] sm:$0xff] }
  0x1a   :  { %231 = vmatpush.msra.mxu1 %v226_v20  ;;  %303 = vmatpush.msra.mxu3 %v226_v20 }
  0x1b   :  { %106 = vmatpush.msra.mxu0 %v89_v6  ;;  %291 = vmatpush.msra.mxu2 %v89_v6 }
  0x1c   :  { %232 = vmatpush.msra.mxu1 %v225_v21  ;;  %304 = vmatpush.msra.mxu3 %v225_v21 }
  0x1d   :  { %107 = vmatpush.msra.mxu0 %v88_v7  ;;  %292 = vmatpush.msra.mxu2 %v88_v7 }
  0x1e   :  { %233 = vmatpush.msra.mxu1 %v224_v23  ;;  %305 = vmatpush.msra.mxu3 %v224_v23 }
  0x1f   :  { %108 = vmatpush.msra.mxu0 %v87_v8  ;;  %293 = vmatpush.msra.mxu2 %v87_v8 }
  0x20   :  { %234 = vmatpush.msra.mxu1 %v223_v25  ;;  %306 = vmatpush.msra.mxu3 %v223_v25 }
  0x21   :  { %109 = vmatpush.msra.mxu0 %v86_v9  ;;  %294 = vmatpush.msra.mxu2 %v86_v9 }
  0x22   :  { %235 = vmatpush.msra.mxu1 %v222_v27  ;;  %307 = vmatpush.msra.mxu3 %v222_v27 }
  0x23   :  { %110 = vmatpush.msra.mxu0 %v85_v10  ;;  %295 = vmatpush.msra.mxu2 %v85_v10 }
  0x24   :  { %236 = vmatpush.msra.mxu1 %v221_v29  ;;  %308 = vmatpush.msra.mxu3 %v221_v29 }
  0x25   :  { %111 = vmatpush.msra.mxu0 %v84_v11  ;;  %296 = vmatpush.msra.mxu2 %v84_v11 }
  0x26   :  { %237 = vmatpush.msra.mxu1 %v220_v30  ;;  %309 = vmatpush.msra.mxu3 %v220_v30 }
  0x27   :  { %112 = vmatpush.msra.mxu0 %v83_v12  ;;  %297 = vmatpush.msra.mxu2 %v83_v12 }
  0x28   :  { %238 = vmatpush.msra.mxu1 %v219_v33  ;;  %310 = vmatpush.msra.mxu3 %v219_v33 }
  0x29   :  { %113 = vmatpush.msra.mxu0 %v82_v13  ;;  %298 = vmatpush.msra.mxu2 %v82_v13 }
  0x2a   :  { %239 = vmatpush.msra.mxu1 %v218_v36  ;;  %311 = vmatpush.msra.mxu3 %v218_v36 }
  0x2b   :  { %114 = vmatpush.msra.mxu0 %v81_v14  ;;  %299 = vmatpush.msra.mxu2 %v81_v14 }
  0x2c   :  { %240 = vmatpush.msra.mxu1 %v217_v39  ;;  %312 = vmatpush.msra.mxu3 %v217_v39 }
  0x2d   :  { %115 = vmatpush.msra.mxu0 %v80_v15  ;;  %300 = vmatpush.msra.mxu2 %v80_v15 }
  0x2e   :  { %116 = vmatmul.f32.vlgmr.msra.gmra.mxu0 %v78_v16  ;;  %119 = vmatmul.f32.vlgmr.msra.gmra.mxu2 %v79_v17 }
  0x2f   :  { %241 = vmatpush.msra.mxu1 %v216_v43  ;;  %313 = vmatpush.msra.mxu3 %v216_v43 }
  0x31   :  { %242 = vmatpush.msra.mxu1 %v215_v47  ;;  %314 = vmatpush.msra.mxu3 %v215_v47 }
  0x33   :  { %243 = vmatpush.msra.mxu1 %v214_v52  ;;  %315 = vmatpush.msra.mxu3 %v214_v52 }
  0x35   :  { %244 = vmatpush.msra.mxu1 %v213_v56  ;;  %316 = vmatpush.msra.mxu3 %v213_v56  ;;  %v324_v56 = vld [vmem:[%s531_s4] ss:$0 sm:$0xff] }
  0xab   :  { %v117_v24 = vpop.f32.mrf.mxu0 }
  0xac   :  { %v488_v26 = vadd.f32 %v323_v22, %v117_v24 }
  0xae   :  { %v491_v28 = vmul.f32 0.70710677, %v488_v26  ;;  %v123_v47 = vmul.f32 0.5, %v488_v26 }
  0xb0   :  { %v127_v31 = vmul.f32 %v491_v28, %v491_v28 }
  0xb1   :  { %v120_v32 = vpop.f32.mrf.mxu2 }
  0xb2   :  { %v495_v34 = vmin.f32 %v127_v31, 16.0  ;;  %v497_v35 = vadd.f32 %v323_v22, %v120_v32 }
  0xb4   :  { %v129_v37 = vmul.f32 2.1237322e-06, %v495_v34  ;;  %v501_v38 = vmul.f32 0.70710677, %v497_v35  ;;  %v140_v40 = vmul.f32 3.8918573e-05, %v495_v34 }
  0xb6   :  { %v130_v41 = vadd.f32 0.00028619796, %v129_v37  ;;  %v167_v42 = vmul.f32 %v501_v38, %v501_v38  ;;  %v141_v44 = vadd.f32 0.001143296, %v140_v40 }
  0xb8   :  { %v131_v45 = vmul.f32 %v130_v41, %v495_v34  ;;  %v168_v46 = vmin.f32 %v167_v42, 16.0  ;;  %v142_v48 = vmul.f32 %v141_v44, %v495_v34 }
  0xba   :  { %v169_v49 = vmul.f32 2.1237322e-06, %v168_v46  ;;  %v180_v50 = vmul.f32 3.8918573e-05, %v168_v46  ;;  %v132_v51 = vadd.f32 0.0036580483, %v131_v45 }
  0xbb   :  { %v143_v53 = vadd.f32 0.014752088, %v142_v48 }
  0xbc   :  { %v170_v54 = vadd.f32 0.00028619796, %v169_v49  ;;  %v181_v55 = vadd.f32 0.001143296, %v180_v50  ;;  %v133_v60 = vmul.f32 %v132_v51, %v495_v34 }
  0xbd   :  { %v144_v57 = vmul.f32 %v143_v53, %v495_v34  ;;  %v124_v53 = vmul.f32 0.5, %v497_v35 }
  0xbe   :  { %v171_v58 = vmul.f32 %v170_v54, %v168_v46  ;;  %v182_v59 = vmul.f32 %v181_v55, %v168_v46  ;;  %v134_v2 = vadd.f32 0.05243302, %v133_v60 }
  0xbf   :  { %v145_v61 = vadd.f32 0.112945676, %v144_v57 }
  0xc0   :  { %v172_v62 = vadd.f32 0.0036580483, %v171_v58  ;;  %v183_v63 = vadd.f32 0.014752088, %v182_v59  ;;  %v135_v8 = vmul.f32 %v134_v2, %v495_v34 }
  0xc1   :  { %v146_v0 = vmul.f32 %v145_v61, %v495_v34 }
  0xc2   :  { %v184_v1 = vmul.f32 %v183_v63, %v168_v46  ;;  %v173_v4 = vmul.f32 %v172_v62, %v168_v46  ;;  %v136_v13 = vadd.f32 0.18741608, %v135_v8 }
  0xc3   :  { %v147_v3 = vadd.f32 0.4994258, %v146_v0 }
  0xc4   :  { %v185_v5 = vadd.f32 0.112945676, %v184_v1  ;;  %v174_v10 = vadd.f32 0.05243302, %v173_v4  ;;  %v137_v17 = vmul.f32 %v136_v13, %v495_v34 }
  0xc5   :  { %v148_v6 = vmul.f32 %v147_v3, %v495_v34 }
  0xc6   :  { %v186_v7 = vmul.f32 %v185_v5, %v168_v46  ;;  %v175_v14 = vmul.f32 %v174_v10, %v168_v46  ;;  %v138_v21 = vadd.f32 1.1283791, %v137_v17 }
  0xc7   :  { %v149_v9 = vadd.f32 1.0, %v148_v6 }
  0xc8   :  { %v187_v11 = vadd.f32 0.4994258, %v186_v7  ;;  %v176_v18 = vadd.f32 0.18741608, %v175_v14  ;;  %v139_v31 = vmul.f32 %v138_v21, %v491_v28 }
  0xc9   :  { %325 = vrcp.f32 %v149_v9  ;;  %v161_v22 = vand.u32 2147483648, %v149_v9  ;;  %v159_v27 = vand.u32 2147483647, %v149_v9  ;;  %vm155_vm1 = vweird.f32 %v149_v9 }
  0xca   :  { %v188_v12 = vmul.f32 %v187_v11, %v168_v46  ;;  %v177_v24 = vmul.f32 %v176_v18, %v168_v46 }
  0xcb   :  { %v162_v32 = vor.u32 1.1754944e-38, %v161_v22  ;;  %vm160_vm3 = vcmp.eq.f32.partialorder %v159_v27, 8.507059e+37 }
  0xcc   :  { %v189_v15 = vadd.f32 1.0, %v188_v12  ;;  %v178_v36 = vadd.f32 1.1283791, %v177_v24 }
  0xce   :  { %327 = vrcp.f32 %v189_v15  ;;  %v201_v37 = vand.u32 2147483648, %v189_v15  ;;  %v199_v41 = vand.u32 2147483647, %v189_v15  ;;  %vm195_vm5 = vweird.f32 %v189_v15 }
  0xcf   :  { %v326_v16 = vpop.eup %325  ;;  %v179_v46 = vmul.f32 %v178_v36, %v501_v38 }
  0xd0   :  { %v151_v19 = vmul.f32 %v326_v16, %v149_v9  ;;  %vm156_vm0 = vweird.f32 %v326_v16  ;;  %v202_v45 = vor.u32 1.1754944e-38, %v201_v37  ;;  %vm200_vm7 = vcmp.eq.f32.partialorder %v199_v41, 8.507059e+37 }
  0xd1   :  { %vm157_vm2 = vmor %vm155_vm1, %vm156_vm0 }
  0xd2   :  { %v152_v20 = vsub.f32 1.0, %v151_v19 }
  0xd4   :  { %v328_v23 = vpop.eup %327  ;;  %v153_v25 = vmul.f32 %v326_v16, %v152_v20 }
  0xd5   :  { %v191_v29 = vmul.f32 %v328_v23, %v189_v15  ;;  %vm196_vm4 = vweird.f32 %v328_v23 }
  0xd6   :  { %v154_v30 = vadd.f32 %v326_v16, %v153_v25  ;;  %vm197_vm6 = vmor %vm195_vm5, %vm196_vm4 }
  0xd7   :  { %v192_v33 = vsub.f32 1.0, %v191_v29 }
  0xd8   :  { %v158_v34 = vsel %vm157_vm2, %v326_v16, %v154_v30 }
  0xd9   :  { %v163_v39 = vsel %vm160_vm3, %v162_v32, %v158_v34  ;;  %v193_v40 = vmul.f32 %v328_v23, %v192_v33 }
  0xda   :  { %v164_v42 = vmul.f32 %v163_v39, %v139_v31 }
  0xdb   :  { %v194_v43 = vadd.f32 %v328_v23, %v193_v40 }
  0xdc   :  { %v283_v44 = vclamps-f32 %v164_v42, 1.0 }
  0xdd   :  { %v198_v28 = vsel %vm197_vm6, %v328_v23, %v194_v43 }
  0xde   :  { %v207_v48 = vadd.f32 1.0, %v283_v44  ;;  %v203_v49 = vsel %vm200_vm7, %v202_v45, %v198_v28 }
  0xdf   :  { %v204_v50 = vmul.f32 %v203_v49, %v179_v46 }
  0xe0   :  { %v209_v51 = vmul.f32 %v207_v48, %v123_v47 }
  0xe1   :  { %v284_v52 = vclamps-f32 %v204_v50, 1.0 }
  0xe2   :  { %245 = vmatmul.f32.vlgmr.msra.gmra.mxu1 %v209_v51 }
  0xe3   :  { %v208_v54 = vadd.f32 1.0, %v284_v52 }
  0xe5   :  { %v210_v55 = vmul.f32 %v208_v54, %v124_v53 }
  0xe7   :  { %248 = vmatmul.f32.vlgmr.msra.gmra.mxu3 %v210_v55 }
 0x15f   :  { %v246_v38 = vpop.f32.mrf.mxu1 }
 0x160   :  { %v252_v57 = vadd.f32 %v324_v56, %v246_v38 }
 0x162   :  { %261 = vst [vmem:[#allocation9] sm:$0xff] %v252_v57 }
 0x16a   :  { %v249_v26 = vpop.f32.mrf.mxu3 }
 0x16b   :  { %v253_v58 = vadd.f32 %v324_v56, %v249_v26 }
 0x16d   :  { %262 = vst [vmem:[#allocation9 + $0x8] sm:$0xff] %v253_v58 }
 0x16e   :  { %275 = dma.vmem_to_hbm [thread:$0]  %s268_s11, 256, %s270_s14, [#allocation5], %s432_s26, %s432_s26, %s433_s27  }
 0x16f   :  { %429 = dma.done.wait [#allocation5], 256  }
 0x170   :  { %430 = vsyncadd [#allocation5], 4294967040 }
 0x171   :  { %280 = vsyncpa [#allocation4], 1 }
 0x172   :  { %281 = vsyncpa [#allocation7], 1 }
 0x173   :  { %282 = vsyncpa [#allocation5], 1 }

</bundles_post_ra>
